<compile_context>
chip_gen: v5e
topology: v5e:2x2
jax: 0.10.0
libtpu: 0.0.40
codegen_flags: <defaults>
</compile_context>

<pallas_src>
import jax
import jax.numpy as jnp
from jax.experimental import pallas as pl
from jax.experimental.pallas import tpu as pltpu

KSIZE = 7
PAD = 3


def _conv_as_matmul_operators(w_conv, H, W):
    """Lower the 2->1 channel, 7x7, zero-padded conv to two (H*W, H*W) matrices.

    conv(cat([avg, max]))[n, ho, wo] == (avg_flat @ A + max_flat @ M)[n, ho*W + wo]
    """
    w = w_conv.astype(jnp.float32)                       # (2, K, K) = (ic, kh, kw)
    hi = jnp.arange(H)
    wi = jnp.arange(W)
    # Contribution of input (hi, wi) to output (ho, wo) uses kernel tap
    # (kh, kw) = (hi - ho + PAD, wi - wo + PAD) when inside [0, K).
    kh = hi[:, None] - hi[None, :] + PAD                 # (H_in, H_out)
    kw = wi[:, None] - wi[None, :] + PAD                 # (W_in, W_out)
    vh = (kh >= 0) & (kh < KSIZE)
    vw = (kw >= 0) & (kw < KSIZE)
    khc = jnp.clip(kh, 0, KSIZE - 1)
    kwc = jnp.clip(kw, 0, KSIZE - 1)
    taps = w[:, khc[:, None, :, None], kwc[None, :, None, :]]      # (2,H,W,H,W)
    valid = (vh[:, None, :, None] & vw[None, :, None, :])[None]    # (1,H,W,H,W)
    op = jnp.where(valid, taps, 0.0).reshape(2, H * W, H * W)
    return op[0], op[1]


def _spatial_attention_kernel(x_ref, a_ref, m_ref, o_ref):
    # x_ref: (Nb, C, H*W)  VMEM -- Nb frames, channels on sublanes, H*W on lanes
    # a_ref: (H*W, H*W)    VMEM -- conv operator for the channel-average map
    # m_ref: (H*W, H*W)    VMEM -- conv operator for the channel-max map
    # o_ref: (Nb, H*W)     VMEM -- sigmoid(spatial attention), lane-dense
    x = x_ref[...].astype(jnp.float32)
    avg = jnp.mean(x, axis=1)                            # (Nb, H*W)
    mx = jnp.max(x, axis=1)                              # (Nb, H*W)
    conv = (jnp.dot(avg, a_ref[...], preferred_element_type=jnp.float32)
            + jnp.dot(mx, m_ref[...], preferred_element_type=jnp.float32))
    o_ref[...] = jax.nn.sigmoid(conv).astype(o_ref.dtype)


def spatial_attention_pallas(x, w_conv, *, block_frames=None):
    """x: (N, C, H, W); w_conv: (2, 7, 7).  Returns (N, 1, H, W) attention map."""
    N, C, H, W = x.shape
    HW = H * W
    itemsize = x.dtype.itemsize
    a_mat, m_mat = _conv_as_matmul_operators(w_conv, H, W)

    # Frames per grid step: target ~4 MiB of input per block (multi-MiB tiles
    # reach 85%+ of HBM roofline vs ~30% for tiny tiles), keep Nb a multiple of
    # 8 so the (Nb, H*W) output block is sublane-aligned, never exceed padded N.
    if block_frames is None:
        per_frame = C * HW * itemsize
        nb = max(8, (4 * 1024 * 1024 // per_frame) // 8 * 8)
        nb = min(nb, pl.cdiv(N, 8) * 8)
    else:
        nb = block_frames
    n_pad = pl.cdiv(N, nb) * nb

    x_flat = x.reshape(N, C, HW)                         # contiguous reshape: free
    if n_pad != N:
        x_flat = jnp.pad(x_flat, ((0, n_pad - N), (0, 0), (0, 0)))

    # Double-buffered in/out blocks + the two resident f32 operators.
    vmem_needed = (2 * nb * C * HW * itemsize
                   + 2 * nb * HW * itemsize
                   + 2 * 2 * HW * HW * 4)
    vmem_limit = int(min(max(vmem_needed + (4 << 20), 32 << 20), 48 << 20))

    out_flat = pl.pallas_call(
        _spatial_attention_kernel,
        out_shape=jax.ShapeDtypeStruct((n_pad, HW), x.dtype),
        grid=(n_pad // nb,),
        in_specs=[
            pl.BlockSpec((nb, C, HW), lambda n: (n, 0, 0)),
            pl.BlockSpec((HW, HW), lambda n: (0, 0)),    # resident, fetched once
            pl.BlockSpec((HW, HW), lambda n: (0, 0)),
        ],
        out_specs=pl.BlockSpec((nb, HW), lambda n: (n, 0)),
        compiler_params=pltpu.CompilerParams(
            dimension_semantics=("parallel",),           # frames independent; v7x dual-TC
            vmem_limit_bytes=vmem_limit),
    )(x_flat, a_mat, m_mat)

    return out_flat[:N].reshape(N, 1, H, W)


def spatial_attention_ref(x, w_conv):
    """Pure-JAX reference of the PyTorch forward, for verification."""
    avg = jnp.mean(x, axis=1, keepdims=True)
    mx = jnp.max(x, axis=1, keepdims=True)
    maps = jnp.concatenate([avg, mx], axis=1)            # (N, 2, H, W)
    conv = jax.lax.conv_general_dilated(
        maps, w_conv.reshape(1, 2, KSIZE, KSIZE), (1, 1),
        [(PAD, PAD), (PAD, PAD)],
        dimension_numbers=("NCHW", "OIHW", "NCHW"),
        precision=jax.lax.Precision.HIGHEST)
    return jax.nn.sigmoid(conv)                          # (N, 1, H, W)


if __name__ == "__main__":
    N, C, H, W = 2, 4, 16, 16
    key = jax.random.PRNGKey(0)
    kx, kw = jax.random.split(key)
    x = jax.random.normal(kx, (N, C, H, W), jnp.float32)
    w_conv = jax.random.normal(kw, (2, KSIZE, KSIZE), jnp.float32) * 0.1

    out = jax.block_until_ready(spatial_attention_pallas(x, w_conv))
    ref = jax.block_until_ready(spatial_attention_ref(x, w_conv))

    assert out.shape == (N, 1, H, W)
    err = float(jnp.max(jnp.abs(out - ref)))
    # 2e-3 leaves headroom for MXU input-rounding differences (f32 accumulate);
    # any structural/indexing bug shows up as >= 1e-1.
    assert err < 2e-3, err
    print("KERNEL_OK")
</pallas_src>

<mosaic_0001>
module attributes {stable_mosaic.version = 11 : i64} {
  func.func @_spatial_attention_kernel(%arg0: i32, %arg1: memref<8x4x256xf32, #tpu.memory_space<vmem>>, %arg2: memref<256x256xf32, #tpu.memory_space<vmem>>, %arg3: memref<256x256xf32, #tpu.memory_space<vmem>>, %arg4: memref<8x256xf32, #tpu.memory_space<vmem>>) attributes {dimension_semantics = [#tpu.dimension_semantics<parallel>], iteration_bounds = array<i64: 1>, scalar_prefetch = 0 : i64, scratch_operands = 0 : i64, tpu.core_type = #tpu.core_type<tc>, window_params = [{transform_indices = @transform_0, window_bounds = array<i64: 8, 4, 256>}, {pipeline_mode = #tpu.pipeline_mode<synchronous>, transform_indices = @transform_1, window_bounds = array<i64: 256, 256>}, {pipeline_mode = #tpu.pipeline_mode<synchronous>, transform_indices = @transform_2, window_bounds = array<i64: 256, 256>}, {transform_indices = @transform_3, window_bounds = array<i64: 8, 256>}]} {
    %c0 = arith.constant 0 : index
    %c0_0 = arith.constant 0 : index
    %c0_1 = arith.constant 0 : index
    %0 = vector.load %arg1[%c0, %c0_0, %c0_1] : memref<8x4x256xf32, #tpu.memory_space<vmem>>, vector<8x4x256xf32>
    %cst = arith.constant dense<0.000000e+00> : vector<8x256xf32>
    %1 = vector.multi_reduction <add>, %0, %cst [1] : vector<8x4x256xf32> to vector<8x256xf32>
    %cst_2 = arith.constant 4.000000e+00 : f32
    %2 = vector.broadcast %cst_2 : f32 to vector<8x256xf32>
    %3 = arith.divf %1, %2 : vector<8x256xf32>
    %cst_3 = arith.constant dense<0xFF800000> : vector<8x256xf32>
    %4 = vector.multi_reduction <maximumf>, %0, %cst_3 [1] : vector<8x4x256xf32> to vector<8x256xf32>
    %c0_4 = arith.constant 0 : index
    %c0_5 = arith.constant 0 : index
    %5 = vector.load %arg2[%c0_4, %c0_5] : memref<256x256xf32, #tpu.memory_space<vmem>>, vector<256x256xf32>
    %cst_6 = arith.constant dense<0.000000e+00> : vector<8x256xf32>
    %6 = tpu.matmul %3, %5, %cst_6 {dimension_numbers = #tpu.dot_dimension_numbers<[1], [0], [0], [1], [0, 0, 1, 1], [], []>} : vector<8x256xf32>, vector<256x256xf32>, vector<8x256xf32> -> vector<8x256xf32>
    %c0_7 = arith.constant 0 : index
    %c0_8 = arith.constant 0 : index
    %7 = vector.load %arg3[%c0_7, %c0_8] : memref<256x256xf32, #tpu.memory_space<vmem>>, vector<256x256xf32>
    %cst_9 = arith.constant dense<0.000000e+00> : vector<8x256xf32>
    %8 = tpu.matmul %4, %7, %cst_9 {dimension_numbers = #tpu.dot_dimension_numbers<[1], [0], [0], [1], [0, 0, 1, 1], [], []>} : vector<8x256xf32>, vector<256x256xf32>, vector<8x256xf32> -> vector<8x256xf32>
    %9 = arith.addf %6, %8 : vector<8x256xf32>
    %10 = arith.negf %9 : vector<8x256xf32>
    %11 = math.exp %10 : vector<8x256xf32>
    %cst_10 = arith.constant 1.000000e+00 : f32
    %12 = vector.broadcast %cst_10 : f32 to vector<8x256xf32>
    %13 = arith.addf %12, %11 : vector<8x256xf32>
    %14 = arith.divf %12, %13 : vector<8x256xf32>
    %c0_11 = arith.constant 0 : index
    %c0_12 = arith.constant 0 : index
    %15 = vector.load %arg4[%c0_11, %c0_12] : memref<8x256xf32, #tpu.memory_space<vmem>>, vector<8x256xf32>
    tpu.vector_store %arg4[%c0_11, %c0_12], %14 {strides = array<i32>} : memref<8x256xf32, #tpu.memory_space<vmem>>, vector<8x256xf32>,
    return
  }
  func.func @transform_0(%arg0: i32) -> (i32, i32, i32) {
    %c0_i32 = arith.constant 0 : i32
    %c0_i32_0 = arith.constant 0 : i32
    %c0_i32_1 = arith.constant 0 : i32
    return %arg0, %c0_i32, %c0_i32_0 : i32, i32, i32
  }
  func.func @transform_1(%arg0: i32) -> (i32, i32) {
    %c0_i32 = arith.constant 0 : i32
    %c0_i32_0 = arith.constant 0 : i32
    %c0_i32_1 = arith.constant 0 : i32
    return %c0_i32, %c0_i32_0 : i32, i32
  }
  func.func @transform_2(%arg0: i32) -> (i32, i32) {
    %c0_i32 = arith.constant 0 : i32
    %c0_i32_0 = arith.constant 0 : i32
    %c0_i32_1 = arith.constant 0 : i32
    return %c0_i32, %c0_i32_0 : i32, i32
  }
  func.func @transform_3(%arg0: i32) -> (i32, i32) {
    %c0_i32 = arith.constant 0 : i32
    %c0_i32_0 = arith.constant 0 : i32
    return %arg0, %c0_i32 : i32, i32
  }
}

</mosaic_0001>

<bundles_post_ra>
// kernel: tpu_custom_call.1
= control target key start
LH: loop header
LB: loop body
LE: loop exit
PB: predicated region body
PF: predicated region fallthrough
CT: control target
= control target key end

     0   :  { %8 = vsyncpa [#allocation3], 0  ;;  %s1158_s0 = inlined_call_operand.hbm [shape: f32[8,4,256], index: 0, kind: input, shape index: {}]   ;;  %s1159_s1 = inlined_call_operand.hbm [shape: f32[256,256], index: 1, kind: input, shape index: {}]   ;;  %s1160_s2 = inlined_call_operand.hbm [shape: f32[256,256], index: 2, kind: input, shape index: {}]   ;;  %s1161_s3 = inlined_call_operand.hbm [shape: f32[8,256], index: 3, kind: output, shape index: {}]  }
   0x1   :  { %9 = vsyncpa [#allocation6], 0  ;;  %s28_s14 = sshll.u32 %s1159_s1, 4  ;;  %s29_s14 = int_to_ptr.hbm [resolvable:$true] %s28_s14 }
   0x2   :  { %10 = vsyncpa [#allocation4], 0  ;;  %s952_s15 = smov [#allocation5]   ;;  %s15_s19 = sshll.u32 %s1158_s0, 4  ;;  %s16_s19 = int_to_ptr.hbm [resolvable:$true] %s15_s19 }
   0x3   :  { %s30_s16 = sshll.u32 %s952_s15, 4  ;;  %s953_s20 = smov 256   ;;  %s31_s16 = int_to_ptr.vmem [resolvable:$true] %s30_s16 }
   0x4   :  { %s954_s21 = smov 16   ;;  %s955_s22 = smov [#allocation2]  }
   0x5   :  { %36 = dma.hbm_to_vmem [thread:$0]  %s29_s14, 8192, %s31_s16, [#allocation6], %s953_s20, %s953_s20, %s954_s21  }
   0x6   :  { %s17_s23 = sshll.u32 %s955_s22, 4  ;;  %s956_s24 = smov 128   ;;  %s18_s23 = int_to_ptr.vmem [resolvable:$true] %s17_s23 }
   0x7   :  { %s957_s25 = smov 8   ;;  %s41_s27 = sshll.u32 %s1160_s2, 4  ;;  %s42_s27 = int_to_ptr.hbm [resolvable:$true] %s41_s27 }
   0x8   :  { %23 = dma.hbm_to_vmem [thread:$0]  %s16_s19, 1024, %s18_s23, [#allocation3], %s956_s24, %s956_s24, %s957_s25  }
   0x9   :  { %s958_s28 = smov [#allocation7]  }
   0xa   :  { %s43_s29 = sshll.u32 %s958_s28, 4  ;;  %s44_s29 = int_to_ptr.vmem [resolvable:$true] %s43_s29 }
   0xb   :  { %49 = dma.hbm_to_vmem [thread:$0]  %s42_s27, 8192, %s44_s29, [#allocation6], %s953_s20, %s953_s20, %s954_s21  }
   0xc   :  { %946 = dma.done.wait [#allocation3], 1024  }
   0xd   :  { %947 = vsyncadd [#allocation3], 4294966272 }
   0xe   :  { %948 = dma.done.wait [#allocation6], 16384  }
   0xf   :  { %949 = vsyncadd [#allocation6], 4294950912  ;;  %v506_v0 = vld [vmem:[#allocation7 + $0xf0] sm:$0xff]  ;;  %v507_v1 = vld [vmem:[#allocation7 + $0xf8] sm:$0xff]  ;;  %vm121_vm0 = vcmask 1043456   ;;  %vm556_vm1 = vcmask 1041409  }
  0x10   :  { %v504_v2 = vld [vmem:[#allocation7 + $0xe0] sm:$0xff]  ;;  %579 = vmatpush.msra.mxu0 %v506_v0  ;;  %619 = vmatpush.msra.mxu2 %v507_v1  ;;  %v538_v3 = vld [vmem:[#allocation7 + $0x1f0] sm:$0xff]  ;;  %v505_v4 = vld [vmem:[#allocation7 + $0xe8] sm:$0xff]  ;;  %vm558_vm2 = vcmask 1042434   ;;  %vm560_vm3 = vcmask 1043459   ;;  %vm562_vm4 = vcmask 1044484  }
  0x11   :  { %v539_v5 = vld [vmem:[#allocation7 + $0x1f8] sm:$0xff]  ;;  %599 = vmatpush.msra.mxu1 %v538_v3  ;;  %v502_v6 = vld [vmem:[#allocation7 + $0xd0] sm:$0xff]  ;;  %v536_v7 = vld [vmem:[#allocation7 + $0x1e0] sm:$0xff]  ;;  %vm564_vm5 = vcmask 1045509   ;;  %vm566_vm6 = vcmask 1046534   ;;  %vm568_vm7 = vcmask 1047559  }
  0x12   :  { %639 = vmatpush.msra.mxu3 %v539_v5  ;;  %v503_v8 = vld [vmem:[#allocation7 + $0xd8] sm:$0xff]  ;;  %580 = vmatpush.msra.mxu0 %v504_v2  ;;  %v537_v9 = vld [vmem:[#allocation7 + $0x1e8] sm:$0xff]  ;;  %v534_v10 = vld [vmem:[#allocation7 + $0x1d0] sm:$0xff]  ;;  %s960_s0 = smov [#allocation8]   ;;  %s818_s5 = sshll.u32 %s1161_s3, 4  ;;  %s819_s5 = int_to_ptr.hbm [resolvable:$true] %s818_s5 }
  0x13   :  { %620 = vmatpush.msra.mxu2 %v505_v4  ;;  %600 = vmatpush.msra.mxu1 %v536_v7  ;;  %v500_v11 = vld [vmem:[#allocation7 + $0xc0] sm:$0xff]  ;;  %v501_v12 = vld [vmem:[#allocation7 + $0xc8] sm:$0xff]  ;;  %v535_v13 = vld [vmem:[#allocation7 + $0x1d8] sm:$0xff]  ;;  %s816_s2 = sshll.u32 %s960_s0, 4  ;;  %s817_s2 = int_to_ptr.vmem [resolvable:$true] %s816_s2 }
  0x14   :  { %640 = vmatpush.msra.mxu3 %v537_v9  ;;  %581 = vmatpush.msra.mxu0 %v502_v6  ;;  %v532_v14 = vld [vmem:[#allocation7 + $0x1c0] sm:$0xff]  ;;  %v533_v15 = vld [vmem:[#allocation7 + $0x1c8] sm:$0xff]  ;;  %v498_v16 = vld [vmem:[#allocation7 + $0xb0] sm:$0xff] }
  0x15   :  { %621 = vmatpush.msra.mxu2 %v503_v8  ;;  %601 = vmatpush.msra.mxu1 %v534_v10  ;;  %v499_v17 = vld [vmem:[#allocation7 + $0xb8] sm:$0xff]  ;;  %v530_v18 = vld [vmem:[#allocation7 + $0x1b0] sm:$0xff]  ;;  %v496_v20 = vld [vmem:[#allocation7 + $0xa0] sm:$0xff] }
  0x16   :  { %641 = vmatpush.msra.mxu3 %v535_v13  ;;  %582 = vmatpush.msra.mxu0 %v500_v11  ;;  %v531_v19 = vld [vmem:[#allocation7 + $0x1b8] sm:$0xff]  ;;  %v497_v21 = vld [vmem:[#allocation7 + $0xa8] sm:$0xff]  ;;  %v528_v22 = vld [vmem:[#allocation7 + $0x1a0] sm:$0xff] }
  0x17   :  { %622 = vmatpush.msra.mxu2 %v501_v12  ;;  %602 = vmatpush.msra.mxu1 %v532_v14  ;;  %v529_v23 = vld [vmem:[#allocation7 + $0x1a8] sm:$0xff]  ;;  %v494_v24 = vld [vmem:[#allocation7 + $0x90] sm:$0xff]  ;;  %v495_v25 = vld [vmem:[#allocation7 + $0x98] sm:$0xff] }
  0x18   :  { %642 = vmatpush.msra.mxu3 %v533_v15  ;;  %583 = vmatpush.msra.mxu0 %v498_v16  ;;  %v526_v26 = vld [vmem:[#allocation7 + $0x190] sm:$0xff]  ;;  %v527_v27 = vld [vmem:[#allocation7 + $0x198] sm:$0xff]  ;;  %v492_v28 = vld [vmem:[#allocation7 + $0x80] sm:$0xff] }
  0x19   :  { %623 = vmatpush.msra.mxu2 %v499_v17  ;;  %603 = vmatpush.msra.mxu1 %v530_v18  ;;  %v493_v29 = vld [vmem:[#allocation7 + $0x88] sm:$0xff]  ;;  %v524_v30 = vld [vmem:[#allocation7 + $0x180] sm:$0xff]  ;;  %v490_v32 = vld [vmem:[#allocation7 + $0x70] sm:$0xff] }
  0x1a   :  { %643 = vmatpush.msra.mxu3 %v531_v19  ;;  %584 = vmatpush.msra.mxu0 %v496_v20  ;;  %v525_v31 = vld [vmem:[#allocation7 + $0x188] sm:$0xff]  ;;  %v491_v33 = vld [vmem:[#allocation7 + $0x78] sm:$0xff]  ;;  %v522_v34 = vld [vmem:[#allocation7 + $0x170] sm:$0xff] }
  0x1b   :  { %624 = vmatpush.msra.mxu2 %v497_v21  ;;  %604 = vmatpush.msra.mxu1 %v528_v22  ;;  %v523_v35 = vld [vmem:[#allocation7 + $0x178] sm:$0xff]  ;;  %v488_v36 = vld [vmem:[#allocation7 + $0x60] sm:$0xff]  ;;  %v489_v37 = vld [vmem:[#allocation7 + $0x68] sm:$0xff] }
  0x1c   :  { %644 = vmatpush.msra.mxu3 %v529_v23  ;;  %585 = vmatpush.msra.mxu0 %v494_v24  ;;  %v520_v38 = vld [vmem:[#allocation7 + $0x160] sm:$0xff]  ;;  %v521_v39 = vld [vmem:[#allocation7 + $0x168] sm:$0xff]  ;;  %v486_v40 = vld [vmem:[#allocation7 + $0x50] sm:$0xff] }
  0x1d   :  { %625 = vmatpush.msra.mxu2 %v495_v25  ;;  %605 = vmatpush.msra.mxu1 %v526_v26  ;;  %v487_v41 = vld [vmem:[#allocation7 + $0x58] sm:$0xff]  ;;  %v518_v42 = vld [vmem:[#allocation7 + $0x150] sm:$0xff]  ;;  %v484_v44 = vld [vmem:[#allocation7 + $0x40] sm:$0xff] }
  0x1e   :  { %645 = vmatpush.msra.mxu3 %v527_v27  ;;  %586 = vmatpush.msra.mxu0 %v492_v28  ;;  %v519_v43 = vld [vmem:[#allocation7 + $0x158] sm:$0xff]  ;;  %v485_v45 = vld [vmem:[#allocation7 + $0x48] sm:$0xff]  ;;  %v516_v46 = vld [vmem:[#allocation7 + $0x140] sm:$0xff] }
  0x1f   :  { %626 = vmatpush.msra.mxu2 %v493_v29  ;;  %606 = vmatpush.msra.mxu1 %v524_v30  ;;  %v517_v47 = vld [vmem:[#allocation7 + $0x148] sm:$0xff]  ;;  %v482_v48 = vld [vmem:[#allocation7 + $0x30] sm:$0xff]  ;;  %v483_v49 = vld [vmem:[#allocation7 + $0x38] sm:$0xff] }
  0x20   :  { %646 = vmatpush.msra.mxu3 %v525_v31  ;;  %587 = vmatpush.msra.mxu0 %v490_v32  ;;  %v514_v50 = vld [vmem:[#allocation7 + $0x130] sm:$0xff]  ;;  %v515_v51 = vld [vmem:[#allocation7 + $0x138] sm:$0xff]  ;;  %v480_v52 = vld [vmem:[#allocation7 + $0x20] sm:$0xff] }
  0x21   :  { %627 = vmatpush.msra.mxu2 %v491_v33  ;;  %607 = vmatpush.msra.mxu1 %v522_v34  ;;  %v481_v53 = vld [vmem:[#allocation7 + $0x28] sm:$0xff]  ;;  %v512_v54 = vld [vmem:[#allocation7 + $0x120] sm:$0xff]  ;;  %v478_v56 = vld [vmem:[#allocation7 + $0x10] sm:$0xff] }
  0x22   :  { %647 = vmatpush.msra.mxu3 %v523_v35  ;;  %588 = vmatpush.msra.mxu0 %v488_v36  ;;  %v513_v55 = vld [vmem:[#allocation7 + $0x128] sm:$0xff]  ;;  %v479_v57 = vld [vmem:[#allocation7 + $0x18] sm:$0xff]  ;;  %v510_v58 = vld [vmem:[#allocation7 + $0x110] sm:$0xff] }
  0x23   :  { %628 = vmatpush.msra.mxu2 %v489_v37  ;;  %608 = vmatpush.msra.mxu1 %v520_v38  ;;  %v511_v59 = vld [vmem:[#allocation7 + $0x118] sm:$0xff]  ;;  %v476_v60 = vld [vmem:[#allocation7] sm:$0xff]  ;;  %v477_v61 = vld [vmem:[#allocation7 + $0x8] sm:$0xff] }
  0x24   :  { %648 = vmatpush.msra.mxu3 %v521_v39  ;;  %589 = vmatpush.msra.mxu0 %v486_v40  ;;  %v442_v62 = vld [vmem:[#allocation5 + $0xf0] sm:$0xff]  ;;  %v443_v63 = vld [vmem:[#allocation5 + $0xf8] sm:$0xff]  ;;  %v508_v0 = vld [vmem:[#allocation7 + $0x100] sm:$0xff] }
  0x25   :  { %629 = vmatpush.msra.mxu2 %v487_v41  ;;  %609 = vmatpush.msra.mxu1 %v518_v42  ;;  %v509_v1 = vld [vmem:[#allocation7 + $0x108] sm:$0xff]  ;;  %v440_v2 = vld [vmem:[#allocation5 + $0xe0] sm:$0xff]  ;;  %v474_v3 = vld [vmem:[#allocation5 + $0x1f0] sm:$0xff] }
  0x26   :  { %649 = vmatpush.msra.mxu3 %v519_v43  ;;  %590 = vmatpush.msra.mxu0 %v484_v44  ;;  %v441_v4 = vld [vmem:[#allocation5 + $0xe8] sm:$0xff]  ;;  %v475_v5 = vld [vmem:[#allocation5 + $0x1f8] sm:$0xff]  ;;  %v438_v6 = vld [vmem:[#allocation5 + $0xd0] sm:$0xff] }
  0x27   :  { %630 = vmatpush.msra.mxu2 %v485_v45  ;;  %610 = vmatpush.msra.mxu1 %v516_v46  ;;  %v472_v7 = vld [vmem:[#allocation5 + $0x1e0] sm:$0xff]  ;;  %v439_v8 = vld [vmem:[#allocation5 + $0xd8] sm:$0xff]  ;;  %v473_v9 = vld [vmem:[#allocation5 + $0x1e8] sm:$0xff] }
  0x28   :  { %650 = vmatpush.msra.mxu3 %v517_v47  ;;  %591 = vmatpush.msra.mxu0 %v482_v48  ;;  %v436_v10 = vld [vmem:[#allocation5 + $0xc0] sm:$0xff]  ;;  %v470_v11 = vld [vmem:[#allocation5 + $0x1d0] sm:$0xff]  ;;  %v437_v12 = vld [vmem:[#allocation5 + $0xc8] sm:$0xff] }
  0x29   :  { %631 = vmatpush.msra.mxu2 %v483_v49  ;;  %611 = vmatpush.msra.mxu1 %v514_v50  ;;  %v471_v13 = vld [vmem:[#allocation5 + $0x1d8] sm:$0xff]  ;;  %v434_v14 = vld [vmem:[#allocation5 + $0xb0] sm:$0xff]  ;;  %v468_v15 = vld [vmem:[#allocation5 + $0x1c0] sm:$0xff] }
  0x2a   :  { %651 = vmatpush.msra.mxu3 %v515_v51  ;;  %592 = vmatpush.msra.mxu0 %v480_v52  ;;  %v990_v16 = vld [vmem:[#allocation2] sm:$0xff]  ;;  %v992_v17 = vld [vmem:[#allocation2 + $0x8] sm:$0xff]  ;;  %v994_v18 = vld [vmem:[#allocation2 + $0x10] sm:$0xff] }
  0x2b   :  { %632 = vmatpush.msra.mxu2 %v481_v53  ;;  %612 = vmatpush.msra.mxu1 %v512_v54  ;;  %v996_v19 = vld [vmem:[#allocation2 + $0x18] sm:$0xff]  ;;  %78 = vst [vmem:[#allocation1] ss:$2 sm:$0xff] %v990_v16  ;;  %v469_v21 = vld [vmem:[#allocation5 + $0x1c8] sm:$0xff]  ;;  %v432_v22 = vld [vmem:[#allocation5 + $0xa0] sm:$0xff] }
  0x2c   :  { %652 = vmatpush.msra.mxu3 %v513_v55  ;;  %593 = vmatpush.msra.mxu0 %v478_v56  ;;  %v435_v20 = vld [vmem:[#allocation5 + $0xb8] sm:$0xff]  ;;  %82 = vst [vmem:[#allocation1 + $0x10] ss:$2 sm:$0xff] %v992_v17  ;;  %v466_v23 = vld [vmem:[#allocation5 + $0x1b0] sm:$0xff]  ;;  %v433_v24 = vld [vmem:[#allocation5 + $0xa8] sm:$0xff] }
  0x2d   :  { %633 = vmatpush.msra.mxu2 %v479_v57  ;;  %613 = vmatpush.msra.mxu1 %v510_v58  ;;  %86 = vst [vmem:[#allocation1 + $0x20] ss:$2 sm:$0xff] %v994_v18  ;;  %v467_v25 = vld [vmem:[#allocation5 + $0x1b8] sm:$0xff]  ;;  %v430_v26 = vld [vmem:[#allocation5 + $0x90] sm:$0xff]  ;;  %v464_v27 = vld [vmem:[#allocation5 + $0x1a0] sm:$0xff] }
  0x2e   :  { %653 = vmatpush.msra.mxu3 %v511_v59  ;;  %594 = vmatpush.msra.mxu0 %v476_v60  ;;  %90 = vst [vmem:[#allocation1 + $0x30] ss:$2 sm:$0xff] %v996_v19  ;;  %v431_v28 = vld [vmem:[#allocation5 + $0x98] sm:$0xff]  ;;  %v465_v29 = vld [vmem:[#allocation5 + $0x1a8] sm:$0xff]  ;;  %v428_v30 = vld [vmem:[#allocation5 + $0x80] sm:$0xff] }
  0x2f   :  { %634 = vmatpush.msra.mxu2 %v477_v61  ;;  %614 = vmatpush.msra.mxu1 %v508_v0  ;;  %v462_v31 = vld [vmem:[#allocation5 + $0x190] sm:$0xff]  ;;  %v429_v32 = vld [vmem:[#allocation5 + $0x88] sm:$0xff]  ;;  %v463_v33 = vld [vmem:[#allocation5 + $0x198] sm:$0xff] }
  0x30   :  { %691 = vmatpush.msrb.mxu0 %v442_v62  ;;  %654 = vmatpush.msra.mxu3 %v509_v1  ;;  %v426_v34 = vld [vmem:[#allocation5 + $0x70] sm:$0xff]  ;;  %v460_v35 = vld [vmem:[#allocation5 + $0x180] sm:$0xff]  ;;  %v427_v36 = vld [vmem:[#allocation5 + $0x78] sm:$0xff] }
  0x31   :  { %731 = vmatpush.msrb.mxu2 %v443_v63  ;;  %711 = vmatpush.msrb.mxu1 %v474_v3  ;;  %v461_v37 = vld [vmem:[#allocation5 + $0x188] sm:$0xff]  ;;  %v1002_v38 = vld [vmem:[#allocation2 + $0x20] sm:$0xff]  ;;  %v458_v42 = vld [vmem:[#allocation5 + $0x170] sm:$0xff] }
  0x32   :  { %692 = vmatpush.msrb.mxu0 %v440_v2  ;;  %751 = vmatpush.msrb.mxu3 %v475_v5  ;;  %v1004_v39 = vld [vmem:[#allocation2 + $0x28] sm:$0xff]  ;;  %v79_v40 = vld.sshfl [vmem:[#allocation1] sm:$0xff pattern:$0x75316420]  ;;  %v424_v41 = vld [vmem:[#allocation5 + $0x60] sm:$0xff] }
  0x33   :  { %732 = vmatpush.msrb.mxu2 %v441_v4  ;;  %712 = vmatpush.msrb.mxu1 %v472_v7  ;;  %v1006_v43 = vld [vmem:[#allocation2 + $0x30] sm:$0xff]  ;;  %v1008_v44 = vld.sshfl [vmem:[#allocation1 + $0x8] sm:$0xff pattern:$0x75316420]  ;;  %v425_v46 = vld [vmem:[#allocation5 + $0x68] sm:$0xff] }
  0x34   :  { %693 = vmatpush.msrb.mxu0 %v438_v6  ;;  %752 = vmatpush.msrb.mxu3 %v473_v9  ;;  %v83_v45 = vld.sshfl [vmem:[#allocation1 + $0x10] sm:$0xff pattern:$0x75316420]  ;;  %v459_v47 = vld [vmem:[#allocation5 + $0x178] sm:$0xff]  ;;  %93 = vst [vmem:[#allocation1] ss:$2 sm:$0xff] %v1002_v38 }
  0x35   :  { %733 = vmatpush.msrb.mxu2 %v439_v8  ;;  %713 = vmatpush.msrb.mxu1 %v470_v11  ;;  %v1010_v48 = vld.sshfl [vmem:[#allocation1 + $0x18] sm:$0xff pattern:$0x75316420]  ;;  %v87_v49 = vld.sshfl [vmem:[#allocation1 + $0x20] sm:$0xff pattern:$0x75316420] }
  0x36   :  { %694 = vmatpush.msrb.mxu0 %v436_v10  ;;  %753 = vmatpush.msrb.mxu3 %v471_v13  ;;  %v1012_v50 = vld.sshfl [vmem:[#allocation1 + $0x28] sm:$0xff pattern:$0x75316420]  ;;  %v91_v51 = vld.sshfl [vmem:[#allocation1 + $0x30] sm:$0xff pattern:$0x75316420] }
  0x37   :  { %734 = vmatpush.msrb.mxu2 %v437_v12  ;;  %714 = vmatpush.msrb.mxu1 %v468_v15  ;;  %v1014_v52 = vld [vmem:[#allocation2 + $0x38] sm:$0xff]  ;;  %v1016_v53 = vld.sshfl [vmem:[#allocation1 + $0x38] sm:$0xff pattern:$0x75316420]  ;;  %v456_v55 = vld [vmem:[#allocation5 + $0x160] sm:$0xff]  ;;  %v122_v6 = vsel %vm121_vm0, %v79_v40, 0.0 }
  0x38   :  { %695 = vmatpush.msrb.mxu0 %v434_v14  ;;  %754 = vmatpush.msrb.mxu3 %v469_v21  ;;  %v422_v54 = vld [vmem:[#allocation5 + $0x50] sm:$0xff]  ;;  %96 = vst [vmem:[#allocation1 + $0x10] ss:$2 sm:$0xff] %v1004_v39  ;;  %v423_v56 = vld [vmem:[#allocation5 + $0x58] sm:$0xff]  ;;  %v457_v57 = vld [vmem:[#allocation5 + $0x168] sm:$0xff]  ;;  %v136_v7 = vsel %vm121_vm0, %v83_v45, 0.0 }
  0x39   :  { %735 = vmatpush.msrb.mxu2 %v435_v20  ;;  %715 = vmatpush.msrb.mxu1 %v466_v23  ;;  %99 = vst [vmem:[#allocation1 + $0x20] ss:$2 sm:$0xff] %v1006_v43  ;;  %v420_v58 = vld [vmem:[#allocation5 + $0x40] sm:$0xff]  ;;  %v454_v59 = vld [vmem:[#allocation5 + $0x150] sm:$0xff]  ;;  %v421_v60 = vld [vmem:[#allocation5 + $0x48] sm:$0xff]  ;;  %v150_v8 = vsel %vm121_vm0, %v87_v49, 0.0 }
  0x3a   :  { %696 = vmatpush.msrb.mxu0 %v432_v22  ;;  %755 = vmatpush.msrb.mxu3 %v467_v25  ;;  %102 = vst [vmem:[#allocation1 + $0x30] ss:$2 sm:$0xff] %v1014_v52  ;;  %v455_v61 = vld [vmem:[#allocation5 + $0x158] sm:$0xff]  ;;  %v123_v9 = vrot.slane %v122_v6, 4  ;;  %v137_v10 = vrot.slane %v136_v7, 4  ;;  %v151_v11 = vrot.slane %v150_v8, 4 }
  0x3b   :  { %736 = vmatpush.msrb.mxu2 %v433_v24  ;;  %716 = vmatpush.msrb.mxu1 %v464_v27  ;;  %v1022_v62 = vld.sshfl [vmem:[#allocation1] sm:$0xff pattern:$0x75316420]  ;;  %v1024_v63 = vld.sshfl [vmem:[#allocation1 + $0x8] sm:$0xff pattern:$0x75316420] }
  0x3c   :  { %697 = vmatpush.msrb.mxu0 %v430_v26  ;;  %756 = vmatpush.msrb.mxu3 %v465_v29  ;;  %257 = vst [vmem:[#allocation1] ss:$2 sm:$0xff] %v990_v16  ;;  %v1046_v12 = vsel %vm121_vm0, %v91_v51, 0.0  ;;  %v1048_v21 = vadd.f32 %v123_v9, %v122_v6  ;;  %v1062_v51 = vadd.f32 %v137_v10, %v136_v7 }
  0x3d   :  { %737 = vmatpush.msrb.mxu2 %v431_v28  ;;  %717 = vmatpush.msrb.mxu1 %v462_v31 }
  0x3e   :  { %698 = vmatpush.msrb.mxu0 %v428_v30  ;;  %757 = vmatpush.msrb.mxu3 %v463_v33 }
  0x3f   :  { %738 = vmatpush.msrb.mxu2 %v429_v32  ;;  %718 = vmatpush.msrb.mxu1 %v460_v35  ;;  %v1026_v0 = vld.sshfl [vmem:[#allocation1 + $0x10] sm:$0xff pattern:$0x75316420]  ;;  %v1028_v1 = vld.sshfl [vmem:[#allocation1 + $0x18] sm:$0xff pattern:$0x75316420] }
  0x40   :  { %699 = vmatpush.msrb.mxu0 %v426_v34  ;;  %758 = vmatpush.msrb.mxu3 %v461_v37  ;;  %v1030_v2 = vld.sshfl [vmem:[#allocation1 + $0x20] sm:$0xff pattern:$0x75316420]  ;;  %v1032_v3 = vld.sshfl [vmem:[#allocation1 + $0x28] sm:$0xff pattern:$0x75316420] }
  0x41   :  { %739 = vmatpush.msrb.mxu2 %v427_v36  ;;  %719 = vmatpush.msrb.mxu1 %v458_v42  ;;  %v1034_v4 = vld.sshfl [vmem:[#allocation1 + $0x30] sm:$0xff pattern:$0x75316420]  ;;  %v1036_v5 = vld.sshfl [vmem:[#allocation1 + $0x38] sm:$0xff pattern:$0x75316420] }
  0x42   :  { %700 = vmatpush.msrb.mxu0 %v424_v41  ;;  %759 = vmatpush.msrb.mxu3 %v459_v47  ;;  %261 = vst [vmem:[#allocation1 + $0x10] ss:$2 sm:$0xff] %v992_v17 }
  0x43   :  { %740 = vmatpush.msrb.mxu2 %v425_v46  ;;  %720 = vmatpush.msrb.mxu1 %v456_v55  ;;  %265 = vst [vmem:[#allocation1 + $0x20] ss:$2 sm:$0xff] %v994_v18  ;;  %v258_v13 = vld.sshfl [vmem:[#allocation1] sm:$0xff pattern:$0x75316420] }
  0x44   :  { %701 = vmatpush.msrb.mxu0 %v422_v54  ;;  %760 = vmatpush.msrb.mxu3 %v457_v57  ;;  %269 = vst [vmem:[#allocation1 + $0x30] ss:$2 sm:$0xff] %v996_v19  ;;  %v259_v14 = vld.sshfl [vmem:[#allocation1 + $0x8] sm:$0xff pattern:$0x75316420]  ;;  %v300_v22 = vsel %vm121_vm0, %v258_v13, -inf  ;;  %v1064_v54 = vadd.f32 %v151_v11, %v150_v8 }
  0x45   :  { %741 = vmatpush.msrb.mxu2 %v423_v56  ;;  %721 = vmatpush.msrb.mxu1 %v454_v59  ;;  %272 = vst [vmem:[#allocation1] ss:$2 sm:$0xff] %v1002_v38  ;;  %v301_v26 = vrot.slane %v300_v22, 4  ;;  %v307_v30 = vsel %vm121_vm0, %v259_v14, -inf }
  0x46   :  { %702 = vmatpush.msrb.mxu0 %v420_v58  ;;  %761 = vmatpush.msrb.mxu3 %v455_v61  ;;  %v308_v38 = vrot.slane %v307_v30, 4 }
  0x47   :  { %742 = vmatpush.msrb.mxu2 %v421_v60  ;;  %v302_v34 = vmax.f32 %v300_v22, %v301_v26 }
  0x48   :  { %v309_v47 = vmax.f32 %v307_v30, %v308_v38  ;;  %v419_v30 = vld [vmem:[#allocation5 + $0x38] sm:$0xff] }
  0x49   :  { %v262_v15 = vld.sshfl [vmem:[#allocation1 + $0x10] sm:$0xff pattern:$0x75316420]  ;;  %v263_v16 = vld.sshfl [vmem:[#allocation1 + $0x18] sm:$0xff pattern:$0x75316420]  ;;  %743 = vmatpush.msrb.mxu2 %v419_v30 }
  0x4a   :  { %v266_v17 = vld.sshfl [vmem:[#allocation1 + $0x20] sm:$0xff pattern:$0x75316420]  ;;  %v267_v18 = vld.sshfl [vmem:[#allocation1 + $0x28] sm:$0xff pattern:$0x75316420] }
  0x4b   :  { %v270_v20 = vld.sshfl [vmem:[#allocation1 + $0x30] sm:$0xff pattern:$0x75316420]  ;;  %v271_v19 = vld.sshfl [vmem:[#allocation1 + $0x38] sm:$0xff pattern:$0x75316420] }
  0x4c   :  { %v314_v23 = vsel %vm121_vm0, %v262_v15, -inf  ;;  %v328_v24 = vsel %vm121_vm0, %v266_v17, -inf  ;;  %v342_v25 = vsel %vm121_vm0, %v270_v20, -inf  ;;  %275 = vst [vmem:[#allocation1 + $0x10] ss:$2 sm:$0xff] %v1004_v39  ;;  %v321_v31 = vsel %vm121_vm0, %v263_v16, -inf }
  0x4d   :  { %v315_v27 = vrot.slane %v314_v23, 4  ;;  %v329_v28 = vrot.slane %v328_v24, 4  ;;  %v343_v29 = vrot.slane %v342_v25, 4  ;;  %278 = vst [vmem:[#allocation1 + $0x20] ss:$2 sm:$0xff] %v1006_v43  ;;  %v335_v32 = vsel %vm121_vm0, %v267_v18, -inf }
  0x4e   :  { %v349_v33 = vsel %vm121_vm0, %v271_v19, -inf  ;;  %281 = vst [vmem:[#allocation1 + $0x30] ss:$2 sm:$0xff] %v1014_v52  ;;  %v322_v39 = vrot.slane %v321_v31, 4  ;;  %v336_v40 = vrot.slane %v335_v32, 4  ;;  %v303_v42 = vrot.slane %v302_v34, 2 }
  0x4f   :  { %v316_v35 = vmax.f32 %v314_v23, %v315_v27  ;;  %v330_v36 = vmax.f32 %v328_v24, %v329_v28  ;;  %v344_v37 = vmax.f32 %v342_v25, %v343_v29  ;;  %v350_v41 = vrot.slane %v349_v33, 4  ;;  %v273_v52 = vld.sshfl [vmem:[#allocation1] sm:$0xff pattern:$0x75316420]  ;;  %v418_v24 = vld [vmem:[#allocation5 + $0x30] sm:$0xff]  ;;  %v452_v25 = vld [vmem:[#allocation5 + $0x140] sm:$0xff] }
  0x50   :  { %v323_v49 = vmax.f32 %v321_v31, %v322_v39  ;;  %v304_v55 = vmax.f32 %v302_v34, %v303_v42  ;;  %v356_v60 = vsel %vm121_vm0, %v273_v52, -inf  ;;  %v310_v61 = vrot.slane %v309_v47, 2  ;;  %703 = vmatpush.msrb.mxu0 %v418_v24  ;;  %722 = vmatpush.msrb.mxu1 %v452_v25  ;;  %v450_v42 = vld [vmem:[#allocation5 + $0x130] sm:$0xff] }
  0x51   :  { %v317_v43 = vrot.slane %v316_v35, 2  ;;  %v331_v45 = vrot.slane %v330_v36, 2  ;;  %v345_v46 = vrot.slane %v344_v37, 2  ;;  %v1067_v9 = vmax.f32 %v335_v32, %v336_v40 }
  0x52   :  { %v324_v6 = vrot.slane %v323_v49, 2  ;;  %v305_v14 = vrot.slane %v304_v55, 1  ;;  %v1069_v7 = vmax.f32 %v349_v33, %v350_v41  ;;  %v357_v11 = vrot.slane %v356_v60, 4  ;;  %v416_v41 = vld [vmem:[#allocation5 + $0x20] sm:$0xff]  ;;  %723 = vmatpush.msrb.mxu1 %v450_v42 }
  0x53   :  { %v318_v56 = vmax.f32 %v316_v35, %v317_v43  ;;  %v332_v57 = vmax.f32 %v330_v36, %v331_v45  ;;  %v346_v58 = vmax.f32 %v344_v37, %v345_v46  ;;  %v276_v59 = vld.sshfl [vmem:[#allocation1 + $0x10] sm:$0xff pattern:$0x75316420]  ;;  %v311_v18 = vmax.f32 %v309_v47, %v310_v61  ;;  %v274_v35 = vld.sshfl [vmem:[#allocation1 + $0x8] sm:$0xff pattern:$0x75316420]  ;;  %704 = vmatpush.msrb.mxu0 %v416_v41 }
  0x54   :  { %v279_v13 = vld.sshfl [vmem:[#allocation1 + $0x20] sm:$0xff pattern:$0x75316420]  ;;  %v370_v17 = vsel %vm121_vm0, %v276_v59, -inf  ;;  %v306_v20 = vmax.f32 %v304_v55, %v305_v14  ;;  %v358_v27 = vmax.f32 %v356_v60, %v357_v11  ;;  %v453_v36 = vld [vmem:[#allocation5 + $0x148] sm:$0xff]  ;;  %v325_v40 = vmax.f32 %v323_v49, %v324_v6  ;;  %v412_v14 = vld [vmem:[#allocation5] sm:$0xff] }
  0x55   :  { %v319_v15 = vrot.slane %v318_v56, 1  ;;  %v333_v16 = vrot.slane %v332_v57, 1  ;;  %v282_v8 = vld.sshfl [vmem:[#allocation1 + $0x30] sm:$0xff pattern:$0x75316420]  ;;  %v347_v10 = vrot.slane %v346_v58, 1  ;;  %762 = vmatpush.msrb.mxu3 %v453_v36 }
  0x56   :  { %v371_v23 = vrot.slane %v370_v17, 4  ;;  %v384_v28 = vsel %vm121_vm0, %v279_v13, -inf  ;;  %v398_v29 = vsel %vm121_vm0, %v282_v8, -inf  ;;  %v359_v37 = vrot.slane %v358_v27, 2  ;;  %v417_v43 = vld [vmem:[#allocation5 + $0x28] sm:$0xff]  ;;  %v415_v6 = vld [vmem:[#allocation5 + $0x18] sm:$0xff] }
  0x57   :  { %v320_v19 = vmax.f32 %v318_v56, %v319_v15  ;;  %v334_v22 = vmax.f32 %v332_v57, %v333_v16  ;;  %v348_v26 = vmax.f32 %v346_v58, %v347_v10  ;;  %v385_v32 = vrot.slane %v384_v28, 4  ;;  %v277_v55 = vld.sshfl [vmem:[#allocation1 + $0x18] sm:$0xff pattern:$0x75316420]  ;;  %v451_v56 = vld [vmem:[#allocation5 + $0x138] sm:$0xff]  ;;  %v448_v58 = vld [vmem:[#allocation5 + $0x120] sm:$0xff]  ;;  %744 = vmatpush.msrb.mxu2 %v417_v43 }
  0x58   :  { %v372_v31 = vmax.f32 %v370_v17, %v371_v23  ;;  %v399_v33 = vrot.slane %v398_v29, 4  ;;  %v312_v39 = vrot.slane %v311_v18, 1  ;;  %v414_v57 = vld [vmem:[#allocation5 + $0x10] sm:$0xff]  ;;  %v360_v59 = vmax.f32 %v358_v27, %v359_v37  ;;  %763 = vmatpush.msrb.mxu3 %v451_v56  ;;  %v449_v13 = vld [vmem:[#allocation5 + $0x128] sm:$0xff]  ;;  %724 = vmatpush.msrb.mxu1 %v448_v58 }
  0x59   :  { %v557_v34 = vsel %vm556_vm1, %v320_v19, %v306_v20  ;;  %v386_v46 = vmax.f32 %v384_v28, %v385_v32  ;;  %v326_v61 = vrot.slane %v325_v40, 1  ;;  %v338_v49 = vrot.slane %v1067_v9, 2  ;;  %705 = vmatpush.msrb.mxu0 %v414_v57  ;;  %v446_v11 = vld [vmem:[#allocation5 + $0x110] sm:$0xff]  ;;  %v413_v17 = vld [vmem:[#allocation5 + $0x8] sm:$0xff]  ;;  %v447_v20 = vld [vmem:[#allocation5 + $0x118] sm:$0xff]  ;;  %745 = vmatpush.msrb.mxu2 %v415_v6 }
  0x5a   :  { %v559_v38 = vsel %vm558_vm2, %v334_v22, %v557_v34  ;;  %v373_v45 = vrot.slane %v372_v31, 2  ;;  %v400_v47 = vmax.f32 %v398_v29, %v399_v33  ;;  %v313_v60 = vmax.f32 %v311_v18, %v312_v39  ;;  %764 = vmatpush.msrb.mxu3 %v449_v13  ;;  %725 = vmatpush.msrb.mxu1 %v446_v11  ;;  %v280_v29 = vld.sshfl [vmem:[#allocation1 + $0x28] sm:$0xff pattern:$0x75316420] }
  0x5b   :  { %v561_v52 = vsel %vm560_vm3, %v348_v26, %v559_v38  ;;  %v387_v16 = vrot.slane %v386_v46, 2  ;;  %v352_v10 = vrot.slane %v1069_v7, 2  ;;  %v361_v19 = vrot.slane %v360_v59, 1  ;;  %706 = vmatpush.msrb.mxu0 %v412_v14  ;;  %746 = vmatpush.msrb.mxu2 %v413_v17 }
  0x5c   :  { %v374_v15 = vmax.f32 %v372_v31, %v373_v45  ;;  %v401_v8 = vrot.slane %v400_v47, 2  ;;  %v327_v18 = vmax.f32 %v325_v40, %v326_v61  ;;  %v339_v22 = vmax.f32 %v1067_v9, %v338_v49  ;;  %765 = vmatpush.msrb.mxu3 %v447_v20 }
  0x5d   :  { %v363_v23 = vsel %vm121_vm0, %v274_v35, -inf  ;;  %v388_v25 = vmax.f32 %v386_v46, %v387_v16  ;;  %v353_v27 = vmax.f32 %v1069_v7, %v352_v10  ;;  %v362_v28 = vmax.f32 %v360_v59, %v361_v19  ;;  %v283_v35 = vld.sshfl [vmem:[#allocation1 + $0x38] sm:$0xff pattern:$0x75316420] }
  0x5e   :  { %v375_v24 = vrot.slane %v374_v15, 1  ;;  %v402_v26 = vmax.f32 %v400_v47, %v401_v8  ;;  %v340_v30 = vrot.slane %v339_v22, 1  ;;  %v364_v31 = vrot.slane %v363_v23, 4 }
  0x5f   :  { %v377_v32 = vsel %vm121_vm0, %v277_v55, -inf  ;;  %v389_v33 = vrot.slane %v388_v25, 1  ;;  %v354_v36 = vrot.slane %v353_v27, 1  ;;  %v563_v37 = vsel %vm562_vm4, %v362_v28, %v561_v52 }
  0x60   :  { %v376_v9 = vmax.f32 %v374_v15, %v375_v24  ;;  %v403_v34 = vrot.slane %v402_v26, 1  ;;  %v341_v38 = vmax.f32 %v339_v22, %v340_v30  ;;  %v365_v39 = vmax.f32 %v363_v23, %v364_v31  ;;  %v444_v30 = vld [vmem:[#allocation5 + $0x100] sm:$0xff]  ;;  %v445_v31 = vld [vmem:[#allocation5 + $0x108] sm:$0xff] }
  0x61   :  { %v378_v7 = vrot.slane %v377_v32, 4  ;;  %v390_v40 = vmax.f32 %v388_v25, %v389_v33  ;;  %v355_v43 = vmax.f32 %v353_v27, %v354_v36  ;;  %v391_v47 = vsel %vm121_vm0, %v280_v29, -inf  ;;  %726 = vmatpush.msrb.mxu1 %v444_v30  ;;  %766 = vmatpush.msrb.mxu3 %v445_v31 }
  0x62   :  { %v404_v41 = vmax.f32 %v402_v26, %v403_v34  ;;  %v565_v42 = vsel %vm564_vm5, %v376_v9, %v563_v37  ;;  %v366_v45 = vrot.slane %v365_v39, 2  ;;  %v405_v55 = vsel %vm121_vm0, %v283_v35, -inf }
  0x63   :  { %v379_v46 = vmax.f32 %v377_v32, %v378_v7  ;;  %v567_v56 = vsel %vm566_vm6, %v390_v40, %v565_v42  ;;  %v392_v57 = vrot.slane %v391_v47, 4  ;;  %v406_v58 = vrot.slane %v405_v55, 4 }
  0x64   :  { %v570_v52 = vsel %vm556_vm1, %v327_v18, %v313_v60  ;;  %v569_v59 = vsel %vm568_vm7, %v404_v41, %v567_v56  ;;  %v367_v61 = vmax.f32 %v365_v39, %v366_v45  ;;  %v125_v16 = vrot.slane %v1048_v21, 2 }
  0x65   :  { %v380_v49 = vrot.slane %v379_v46, 2  ;;  %v571_v6 = vsel %vm558_vm2, %v341_v38, %v570_v52  ;;  %595 = vmatmul.f32.vlgmr.msra.gmra.mxu0 %v569_v59  ;;  %635 = vmatmul.f32.vlgmr.msra.gmra.mxu2 %v569_v59  ;;  %v393_v13 = vmax.f32 %v391_v47, %v392_v57  ;;  %v407_v14 = vmax.f32 %v405_v55, %v406_v58 }
  0x66   :  { %v572_v15 = vsel %vm560_vm3, %v355_v43, %v571_v6  ;;  %v368_v8 = vrot.slane %v367_v61, 1  ;;  %v139_v11 = vrot.slane %v1062_v51, 2  ;;  %v153_v60 = vrot.slane %v1064_v54, 2 }
  0x67   :  { %v381_v10 = vmax.f32 %v379_v46, %v380_v49  ;;  %v394_v17 = vrot.slane %v393_v13, 2  ;;  %v408_v20 = vrot.slane %v407_v14, 2  ;;  %v126_v19 = vadd.f32 %v125_v16, %v1048_v21 }
  0x68   :  { %v165_v18 = vrot.slane %v1046_v12, 4  ;;  %v369_v22 = vmax.f32 %v367_v61, %v368_v8  ;;  %v140_v24 = vadd.f32 %v139_v11, %v1062_v51  ;;  %v154_v25 = vadd.f32 %v153_v60, %v1064_v54 }
  0x69   :  { %v382_v23 = vrot.slane %v381_v10, 1  ;;  %v395_v26 = vmax.f32 %v393_v13, %v394_v17  ;;  %v409_v27 = vmax.f32 %v407_v14, %v408_v20  ;;  %v127_v28 = vrot.slane %v126_v19, 1 }
  0x6a   :  { %v166_v29 = vadd.f32 %v165_v18, %v1046_v12  ;;  %v573_v9 = vsel %vm562_vm4, %v369_v22, %v572_v15  ;;  %v141_v33 = vrot.slane %v140_v24, 1  ;;  %v155_v21 = vrot.slane %v154_v25, 1 }
  0x6b   :  { %v383_v32 = vmax.f32 %v381_v10, %v382_v23  ;;  %v396_v34 = vrot.slane %v395_v26, 1  ;;  %v410_v35 = vrot.slane %v409_v27, 1  ;;  %v1101_v36 = vadd.f32 %v127_v28, %v126_v19 }
  0x6c   :  { %v167_v51 = vrot.slane %v166_v29, 2  ;;  %v1104_v37 = vadd.f32 %v141_v33, %v140_v24  ;;  %v1106_v38 = vadd.f32 %v155_v21, %v154_v25  ;;  %v178_v12 = vsel %vm121_vm0, %v1022_v62, 0.0 }
  0x6d   :  { %v574_v54 = vsel %vm564_vm5, %v383_v32, %v573_v9  ;;  %v397_v39 = vmax.f32 %v395_v26, %v396_v34  ;;  %v411_v7 = vmax.f32 %v409_v27, %v410_v35  ;;  %v179_v41 = vrot.slane %v178_v12, 4 }
  0x6e   :  { %v168_v40 = vadd.f32 %v167_v51, %v166_v29  ;;  %v192_v42 = vsel %vm121_vm0, %v1026_v0, 0.0  ;;  %v206_v43 = vsel %vm121_vm0, %v1030_v2, 0.0  ;;  %v220_v45 = vsel %vm121_vm0, %v1034_v4, 0.0 }
  0x6f   :  { %v575_v46 = vsel %vm566_vm6, %v397_v39, %v574_v54  ;;  %v180_v55 = vadd.f32 %v179_v41, %v178_v12  ;;  %v193_v56 = vrot.slane %v192_v42, 4  ;;  %v207_v57 = vrot.slane %v206_v43, 4 }
  0x70   :  { %v169_v47 = vrot.slane %v168_v40, 1  ;;  %v576_v62 = vsel %vm568_vm7, %v411_v7, %v575_v46  ;;  %v221_v58 = vrot.slane %v220_v45, 4  ;;  %v959_v52 = vmov 4.0  }
  0x71   :  { %840 = vrcp.f32 %v959_v52  ;;  %655 = vmatmul.f32.vlgmr.msra.gmra.mxu3 %v576_v62  ;;  %615 = vmatmul.f32.vlgmr.msra.gmra.mxu1 %v576_v62  ;;  %v181_v59 = vrot.slane %v180_v55, 2  ;;  %v194_v2 = vadd.f32 %v193_v56, %v192_v42  ;;  %v129_v4 = vsel %vm121_vm0, %v1008_v44, 0.0 }
  0x72   :  { %v1118_v0 = vadd.f32 %v169_v47, %v168_v40  ;;  %v208_v61 = vadd.f32 %v207_v57, %v206_v43  ;;  %v222_v49 = vadd.f32 %v221_v58, %v220_v45  ;;  %v130_v6 = vrot.slane %v129_v4, 4 }
  0x73   :  { %v143_v13 = vsel %vm121_vm0, %v1010_v48, 0.0  ;;  %v182_v14 = vadd.f32 %v181_v59, %v180_v55  ;;  %v195_v15 = vrot.slane %v194_v2, 2  ;;  %v157_v8 = vsel %vm121_vm0, %v1012_v50, 0.0 }
  0x74   :  { %v144_v16 = vrot.slane %v143_v13, 4  ;;  %v209_v10 = vrot.slane %v208_v61, 2  ;;  %v223_v11 = vrot.slane %v222_v49, 2  ;;  %v131_v60 = vadd.f32 %v130_v6, %v129_v4 }
  0x75   :  { %v158_v17 = vrot.slane %v157_v8, 4  ;;  %v183_v20 = vrot.slane %v182_v14, 1  ;;  %v196_v19 = vadd.f32 %v195_v15, %v194_v2  ;;  %v171_v44 = vsel %vm121_vm0, %v1016_v53, 0.0 }
  0x76   :  { %v145_v18 = vadd.f32 %v144_v16, %v143_v13  ;;  %v210_v23 = vadd.f32 %v209_v10, %v208_v61  ;;  %v224_v24 = vadd.f32 %v223_v11, %v222_v49  ;;  %v132_v48 = vrot.slane %v131_v60, 2 }
  0x77   :  { %v841_v22 = vpop.eup %840  ;;  %v159_v25 = vadd.f32 %v158_v17, %v157_v8  ;;  %v184_v26 = vadd.f32 %v183_v20, %v182_v14  ;;  %v197_v27 = vrot.slane %v196_v19, 1  ;;  %v172_v21 = vrot.slane %v171_v44, 4 }
  0x78   :  { %v235_v28 = vmul.f32 4.0, %v841_v22  ;;  %vm239_vm8 = vweird.f32 %v841_v22  ;;  %v211_v50 = vrot.slane %v210_v23, 1  ;;  %v225_v29 = vrot.slane %v224_v24, 1 }
  0x79   :  { %v133_v30 = vadd.f32 %v132_v48, %v131_v60  ;;  %v146_v31 = vrot.slane %v145_v18, 2  ;;  %v198_v32 = vadd.f32 %v197_v27, %v196_v19  ;;  %v160_v33 = vrot.slane %v159_v25, 2 }
  0x7a   :  { %v236_v9 = vsub.f32 1.0, %v235_v28  ;;  %v212_v34 = vadd.f32 %v211_v50, %v210_v23  ;;  %v226_v35 = vadd.f32 %v225_v29, %v224_v24  ;;  %v173_v39 = vadd.f32 %v172_v21, %v171_v44 }
  0x7b   :  { %v134_v53 = vrot.slane %v133_v30, 1  ;;  %v147_v51 = vadd.f32 %v146_v31, %v145_v18  ;;  %v161_v12 = vadd.f32 %v160_v33, %v159_v25  ;;  %v185_v7 = vsel %vm121_vm0, %v1024_v63, 0.0 }
  0x7c   :  { %v237_v54 = vmul.f32 %v841_v22, %v236_v9  ;;  %v186_v42 = vrot.slane %v185_v7, 4  ;;  %v199_v43 = vsel %vm121_vm0, %v1028_v1, 0.0  ;;  %v174_v47 = vrot.slane %v173_v39, 2 }
  0x7d   :  { %v135_v40 = vadd.f32 %v134_v53, %v133_v30  ;;  %v148_v41 = vrot.slane %v147_v51, 1  ;;  %v162_v46 = vrot.slane %v161_v12, 1  ;;  %v200_v55 = vrot.slane %v199_v43, 4 }
  0x7e   :  { %v238_v45 = vadd.f32 %v841_v22, %v237_v54  ;;  %v187_v62 = vadd.f32 %v186_v42, %v185_v7  ;;  %v213_v57 = vsel %vm121_vm0, %v1032_v3, 0.0  ;;  %v227_v58 = vsel %vm121_vm0, %v1036_v5, 0.0 }
  0x7f   :  { %v149_v56 = vadd.f32 %v148_v41, %v147_v51  ;;  %v163_v52 = vadd.f32 %v162_v46, %v161_v12  ;;  %v175_v59 = vadd.f32 %v174_v47, %v173_v39  ;;  %v201_v2 = vadd.f32 %v200_v55, %v199_v43 }
  0x80   :  { %v240_v63 = vsel %vm239_vm8, %v841_v22, %v238_v45  ;;  %v188_v16 = vrot.slane %v187_v62, 2  ;;  %v214_v11 = vrot.slane %v213_v57, 4  ;;  %v228_v60 = vrot.slane %v227_v58, 4 }
  0x81   :  { %v241_v4 = vmul.f32 %v240_v63, %v1101_v36  ;;  %v243_v1 = vmul.f32 %v240_v63, %v1104_v37  ;;  %v245_v61 = vmul.f32 %v240_v63, %v1106_v38  ;;  %v247_v49 = vmul.f32 %v240_v63, %v1118_v0 }
  0x82   :  { %v249_v6 = vmul.f32 %v240_v63, %v184_v26  ;;  %v251_v13 = vmul.f32 %v240_v63, %v198_v32  ;;  %v253_v14 = vmul.f32 %v240_v63, %v212_v34  ;;  %v255_v3 = vmul.f32 %v240_v63, %v226_v35 }
  0x83   :  { %v675_v15 = vsel %vm556_vm1, %v243_v1, %v241_v4  ;;  %v176_v5 = vrot.slane %v175_v59, 1  ;;  %v202_v8 = vrot.slane %v201_v2, 2  ;;  %v242_v36 = vmul.f32 %v240_v63, %v135_v40 }
  0x84   :  { %v676_v10 = vsel %vm558_vm2, %v245_v61, %v675_v15  ;;  %v189_v38 = vadd.f32 %v188_v16, %v187_v62  ;;  %v215_v19 = vadd.f32 %v214_v11, %v213_v57  ;;  %v229_v18 = vadd.f32 %v228_v60, %v227_v58 }
  0x85   :  { %v677_v37 = vsel %vm560_vm3, %v247_v49, %v676_v10  ;;  %v177_v17 = vadd.f32 %v176_v5, %v175_v59  ;;  %v203_v20 = vadd.f32 %v202_v8, %v201_v2  ;;  %v244_v44 = vmul.f32 %v240_v63, %v149_v56 }
  0x86   :  { %v678_v0 = vsel %vm562_vm4, %v249_v6, %v677_v37  ;;  %v190_v23 = vrot.slane %v189_v38, 1  ;;  %v246_v48 = vmul.f32 %v240_v63, %v163_v52  ;;  %v216_v26 = vrot.slane %v215_v19, 2 }
  0x87   :  { %v679_v22 = vsel %vm564_vm5, %v251_v13, %v678_v0  ;;  %v204_v24 = vrot.slane %v203_v20, 1  ;;  %v230_v27 = vrot.slane %v229_v18, 2  ;;  %v248_v28 = vmul.f32 %v240_v63, %v177_v17 }
  0x88   :  { %v680_v25 = vsel %vm566_vm6, %v253_v14, %v679_v22  ;;  %v191_v29 = vadd.f32 %v190_v23, %v189_v38  ;;  %v682_v31 = vsel %vm556_vm1, %v244_v44, %v242_v36  ;;  %v217_v32 = vadd.f32 %v216_v26, %v215_v19 }
  0x89   :  { %v681_v50 = vsel %vm568_vm7, %v255_v3, %v680_v25  ;;  %v205_v30 = vadd.f32 %v204_v24, %v203_v20  ;;  %v231_v9 = vadd.f32 %v230_v27, %v229_v18  ;;  %v683_v33 = vsel %vm558_vm2, %v246_v48, %v682_v31 }
  0x8a   :  { %707 = vmatmul.f32.vlgmr.msrb.gmra.mxu0 %v681_v50  ;;  %747 = vmatmul.f32.vlgmr.msrb.gmra.mxu2 %v681_v50  ;;  %v250_v21 = vmul.f32 %v240_v63, %v191_v29  ;;  %v684_v35 = vsel %vm560_vm3, %v248_v28, %v683_v33  ;;  %v218_v53 = vrot.slane %v217_v32, 1 }
  0x8b   :  { %v252_v34 = vmul.f32 %v240_v63, %v205_v30  ;;  %v232_v51 = vrot.slane %v231_v9, 1 }
  0x8c   :  { %v685_v54 = vsel %vm562_vm4, %v250_v21, %v684_v35  ;;  %v219_v12 = vadd.f32 %v218_v53, %v217_v32 }
  0x8d   :  { %v233_v39 = vadd.f32 %v232_v51, %v231_v9  ;;  %v686_v7 = vsel %vm564_vm5, %v252_v34, %v685_v54 }
  0x8e   :  { %v254_v40 = vmul.f32 %v240_v63, %v219_v12 }
  0x8f   :  { %v256_v41 = vmul.f32 %v240_v63, %v233_v39 }
  0x90   :  { %v687_v42 = vsel %vm566_vm6, %v254_v40, %v686_v7 }
  0x91   :  { %v688_v43 = vsel %vm568_vm7, %v256_v41, %v687_v42 }
  0x92   :  { %727 = vmatmul.f32.vlgmr.msrb.gmra.mxu1 %v688_v43  ;;  %767 = vmatmul.f32.vlgmr.msrb.gmra.mxu3 %v688_v43 }
  0xe2   :  { %v596_v45 = vpop.f32.mrf.mxu0 }
  0xe8   :  { %v636_v47 = vpop.f32.mrf.mxu2 }
  0xee   :  { %v616_v46 = vpop.f32.mrf.mxu1 }
  0xef   :  { %v617_v55 = vadd.f32 %v616_v46, %v596_v45 }
  0xf4   :  { %v656_v57 = vpop.f32.mrf.mxu3 }
  0xf5   :  { %v657_v59 = vadd.f32 %v656_v57, %v636_v47 }
 0x107   :  { %v708_v56 = vpop.f32.mrf.mxu0 }
 0x108   :  { %v709_v62 = vadd.f32 %v708_v56, %v617_v55 }
 0x10d   :  { %v748_v52 = vpop.f32.mrf.mxu2 }
 0x10e   :  { %v749_v1 = vadd.f32 %v748_v52, %v657_v59 }
 0x10f   :  { %v728_v58 = vpop.f32.mrf.mxu1 }
 0x110   :  { %v729_v2 = vadd.f32 %v728_v58, %v709_v62 }
 0x112   :  { %v829_v4 = vmul.f32 -1.442695, %v729_v2 }
 0x114   :  { %842 = vpow2.f32 %v829_v4 }
 0x115   :  { %v768_v63 = vpop.f32.mrf.mxu3 }
 0x116   :  { %v769_v61 = vadd.f32 %v768_v63, %v749_v1 }
 0x118   :  { %v830_v49 = vmul.f32 -1.442695, %v769_v61 }
 0x11a   :  { %v843_v6 = vpop.eup %842  ;;  %844 = vpow2.f32 %v830_v49 }
 0x11b   :  { %v777_v13 = vadd.f32 1.0, %v843_v6 }
 0x11d   :  { %846 = vrcp.f32 %v777_v13  ;;  %v790_v8 = vand.u32 2147483648, %v777_v13  ;;  %v788_v11 = vand.u32 2147483647, %v777_v13  ;;  %vm784_vm10 = vweird.f32 %v777_v13 }
 0x11f   :  { %v791_v17 = vor.u32 1.1754944e-38, %v790_v8  ;;  %vm789_vm12 = vcmp.eq.f32.partialorder %v788_v11, 8.507059e+37 }
 0x120   :  { %v845_v14 = vpop.eup %844 }
 0x121   :  { %v778_v3 = vadd.f32 1.0, %v845_v14 }
 0x123   :  { %v847_v15 = vpop.eup %846  ;;  %848 = vrcp.f32 %v778_v3  ;;  %v805_v19 = vand.u32 2147483648, %v778_v3  ;;  %v803_v44 = vand.u32 2147483647, %v778_v3  ;;  %vm799_vm14 = vweird.f32 %v778_v3 }
 0x124   :  { %v780_v5 = vmul.f32 %v847_v15, %v777_v13  ;;  %vm785_vm9 = vweird.f32 %v847_v15 }
 0x125   :  { %vm786_vm11 = vmor %vm784_vm10, %vm785_vm9  ;;  %v806_v23 = vor.u32 1.1754944e-38, %v805_v19  ;;  %vm804_vm0 = vcmp.eq.f32.partialorder %v803_v44, 8.507059e+37 }
 0x126   :  { %v781_v16 = vsub.f32 1.0, %v780_v5 }
 0x128   :  { %v782_v10 = vmul.f32 %v847_v15, %v781_v16 }
 0x129   :  { %v849_v60 = vpop.eup %848 }
 0x12a   :  { %v795_v36 = vmul.f32 %v849_v60, %v778_v3  ;;  %v783_v37 = vadd.f32 %v847_v15, %v782_v10  ;;  %vm800_vm13 = vweird.f32 %v849_v60 }
 0x12b   :  { %vm801_vm15 = vmor %vm799_vm14, %vm800_vm13 }
 0x12c   :  { %v796_v38 = vsub.f32 1.0, %v795_v36  ;;  %v787_v20 = vsel %vm786_vm11, %v847_v15, %v783_v37 }
 0x12d   :  { %v792_v0 = vsel %vm789_vm12, %v791_v17, %v787_v20 }
 0x12e   :  { %v797_v18 = vmul.f32 %v849_v60, %v796_v38  ;;  %809 = vst [vmem:[#allocation8] sm:$0xff] %v792_v0 }
 0x130   :  { %v798_v22 = vadd.f32 %v849_v60, %v797_v18 }
 0x132   :  { %v802_v24 = vsel %vm801_vm15, %v849_v60, %v798_v22 }
 0x133   :  { %v807_v48 = vsel %vm804_vm0, %v806_v23, %v802_v24 }
 0x134   :  { %810 = vst [vmem:[#allocation8 + $0x8] sm:$0xff] %v807_v48 }
 0x135   :  { %821 = dma.vmem_to_hbm [thread:$0]  %s817_s2, 256, %s819_s5, [#allocation4]  }
 0x136   :  { %950 = dma.done.wait [#allocation4], 256  }
 0x137   :  { %951 = vsyncadd [#allocation4], 4294967040 }
 0x138   :  { %826 = vsyncpa [#allocation3], 1 }
 0x139   :  { %827 = vsyncpa [#allocation6], 1 }
 0x13a   :  { %828 = vsyncpa [#allocation4], 1 }

</bundles_post_ra>
